<compile_context>
chip_gen: v7x
topology: tpu7x:2x2x1
jax: 0.10.0
libtpu: 0.0.40
codegen_flags: <defaults>
</compile_context>

<pallas_src>
import functools

import jax
import jax.numpy as jnp
from jax.experimental import pallas as pl
from jax.experimental.pallas import tpu as pltpu

_BLOCK_BYTES = 2 * 1024 * 1024  # per-block byte budget (x tile)


def _largest_lane_tile(s_total, cap_elems):
    """Largest multiple-of-128 divisor of s_total <= cap_elems (else full axis)."""
    cap_elems = max(128, int(cap_elems))
    if s_total <= cap_elems or s_total % 128 != 0:
        return s_total
    best = s_total
    t = 128
    while t <= cap_elems:
        if s_total % t == 0:
            best = t
        t += 128
    return best if best <= cap_elems else s_total


def _largest_row_tile(rows, cap_rows=256):
    """Largest multiple-of-8 divisor of rows <= cap_rows (else full axis)."""
    if rows <= cap_rows or rows % 8 != 0:
        return rows
    best = 8
    t = 8
    while t <= cap_rows:
        if rows % t == 0:
            best = t
        t += 8
    return best


def _pool_excite_kernel(x_ref, w1_ref, b1_ref, w2_ref, b2_ref, w3_ref, b3_ref,
                        y_ref, acc_ref, *, inv_s):
    # x_ref : (1, C, tS)   lane-dense spatial tile of one batch element
    # w1_ref: (Cr, C)      fc1 weight (torch layout: out x in, C on lanes)
    # b1_ref: (Cr, 1)      fc1 bias
    # w2_ref: (Cr, 1)      fc2 weight (transposed to a column)
    # b2_ref: (1, 1)       fc2 bias
    # w3_ref: (C, 1)       fc3 weight (torch layout)
    # b3_ref: (C, 1)       fc3 bias
    # y_ref : (1, C, 1)    per-channel gate for this batch element
    # acc_ref: (1, C) f32  spatial-sum accumulator (VMEM scratch)
    s = pl.program_id(1)

    @pl.when(s == 0)
    def _():
        acc_ref[...] = jnp.zeros_like(acc_ref)

    xb = x_ref[...].astype(jnp.float32)              # (1, C, tS)
    acc_ref[...] += jnp.sum(xb, axis=-1)             # lane reduce -> (1, C)

    @pl.when(s == pl.num_programs(1) - 1)
    def _():
        pooled = acc_ref[...] * inv_s                # (1, C)  global average pool
        # fc1 + ReLU: each output feature = lane-dot of pooled with a row of w1.
        h1 = jnp.sum(pooled * w1_ref[...], axis=-1, keepdims=True) + b1_ref[...]  # (Cr, 1)
        h1 = jnp.maximum(h1, 0.0)
        # fc2: scalar = sum_j h1[j] * w2[j] + b2 (sublane reduce of a tiny column).
        h2 = jnp.sum(h1 * w2_ref[...], axis=0, keepdims=True) + b2_ref[...]       # (1, 1)
        gate = 1.0 / (1.0 + jnp.exp(-h2))            # sigmoid (EUP exp + VPU)
        # fc3: per-channel gate vector, channel-on-sublane to match y layout.
        y = gate * w3_ref[...] + b3_ref[...]         # (C, 1)
        y_ref[0] = y.astype(y_ref.dtype)


def _scale_kernel(x_ref, y_ref, o_ref):
    # x_ref: (tR, tS), y_ref: (tR, 1) -> broadcast over lanes, lane-dense store.
    o_ref[...] = (x_ref[...] * y_ref[...]).astype(o_ref.dtype)


def ce_block(x, w1, b1, w2, b2, w3, b3):
    """Forward pass of CEBlock.  x: (N, C, D, H, W); weights in torch nn.Linear layout."""
    N, C, D, H, W = x.shape
    S = D * H * W
    NC = N * C
    Cr = w1.shape[0]
    itemsize = jnp.dtype(x.dtype).itemsize

    x3 = x.reshape(N, C, S)                          # free reshape, no HBM pass

    w1_2d = w1.astype(jnp.float32)                   # (Cr, C)
    b1_2d = b1.reshape(Cr, 1).astype(jnp.float32)
    w2_2d = w2.reshape(Cr, 1).astype(jnp.float32)    # torch (1, Cr) -> (Cr, 1)
    b2_2d = b2.reshape(1, 1).astype(jnp.float32)
    w3_2d = w3.reshape(C, 1).astype(jnp.float32)     # torch (C, 1)
    b3_2d = b3.reshape(C, 1).astype(jnp.float32)

    # ---------------- Pass 1: global average pool + excitation MLP ----------------
    tS1 = _largest_lane_tile(S, _BLOCK_BYTES // (C * itemsize))
    n_s1 = S // tS1
    kernel1 = functools.partial(_pool_excite_kernel, inv_s=1.0 / float(S))

    y = pl.pallas_call(
        kernel1,
        out_shape=jax.ShapeDtypeStruct((N, C, 1), jnp.float32),
        grid_spec=pltpu.PrefetchScalarGridSpec(
            num_scalar_prefetch=0,
            grid=(N, n_s1),
            in_specs=[
                pl.BlockSpec((1, C, tS1), lambda n, s: (n, 0, s)),
                pl.BlockSpec((Cr, C), lambda n, s: (0, 0)),
                pl.BlockSpec((Cr, 1), lambda n, s: (0, 0)),
                pl.BlockSpec((Cr, 1), lambda n, s: (0, 0)),
                pl.BlockSpec((1, 1), lambda n, s: (0, 0)),
                pl.BlockSpec((C, 1), lambda n, s: (0, 0)),
                pl.BlockSpec((C, 1), lambda n, s: (0, 0)),
            ],
            out_specs=pl.BlockSpec((1, C, 1), lambda n, s: (n, 0, 0)),
            scratch_shapes=[pltpu.VMEM((1, C), jnp.float32)],
        ),
        compiler_params=pltpu.CompilerParams(
            dimension_semantics=("parallel", "arbitrary")),
    )(x3, w1_2d, b1_2d, w2_2d, b2_2d, w3_2d, b3_2d)

    # ---------------- Pass 2: broadcast gating x * y (fully flattened) ------------
    x2 = x3.reshape(NC, S)                           # free reshape
    y2 = y.reshape(NC, 1)                            # free reshape
    tR = _largest_row_tile(NC)
    tS2 = _largest_lane_tile(S, _BLOCK_BYTES // (tR * itemsize))

    out2 = pl.pallas_call(
        _scale_kernel,
        out_shape=jax.ShapeDtypeStruct((NC, S), x.dtype),
        grid_spec=pltpu.PrefetchScalarGridSpec(
            num_scalar_prefetch=0,
            grid=(NC // tR, S // tS2),
            in_specs=[
                pl.BlockSpec((tR, tS2), lambda r, s: (r, s)),
                pl.BlockSpec((tR, 1), lambda r, s: (r, 0)),
            ],
            out_specs=pl.BlockSpec((tR, tS2), lambda r, s: (r, s)),
        ),
        compiler_params=pltpu.CompilerParams(
            dimension_semantics=("parallel", "parallel")),
    )(x2, y2)

    return out2.reshape(N, C, D, H, W)


def _reference(x, w1, b1, w2, b2, w3, b3):
    n, c = x.shape[:2]
    y = jnp.mean(x, axis=(2, 3, 4))              # AdaptiveAvgPool3d(1) + view
    y = jnp.maximum(y @ w1.T + b1, 0.0)          # fc1 + ReLU
    y = y @ w2.T + b2                            # fc2
    y = jax.nn.sigmoid(y)                        # Sigmoid
    y = y @ w3.T + b3                            # fc3
    return x * y.reshape(n, c, 1, 1, 1)          # channel gating


if __name__ == "__main__":
    key = jax.random.PRNGKey(0)
    kx, k1, k2, k3, k4, k5, k6 = jax.random.split(key, 7)

    N, C, D, H, W = 2, 4, 16, 16, 16
    reduction_ratio = 2
    Cr = C // reduction_ratio

    x = jax.random.normal(kx, (N, C, D, H, W), jnp.float32)
    w1 = 0.5 * jax.random.normal(k1, (Cr, C), jnp.float32)   # nn.Linear(C, Cr).weight
    b1 = 0.1 * jax.random.normal(k2, (Cr,), jnp.float32)
    w2 = 0.5 * jax.random.normal(k3, (1, Cr), jnp.float32)   # nn.Linear(Cr, 1).weight
    b2 = 0.1 * jax.random.normal(k4, (1,), jnp.float32)
    w3 = 0.5 * jax.random.normal(k5, (C, 1), jnp.float32)    # nn.Linear(1, C).weight
    b3 = 0.1 * jax.random.normal(k6, (C,), jnp.float32)

    out = ce_block(x, w1, b1, w2, b2, w3, b3)
    out = jax.block_until_ready(out)

    ref = _reference(x, w1, b1, w2, b2, w3, b3)
    assert out.shape == x.shape, out.shape
    max_err = float(jnp.max(jnp.abs(out - ref)))
    assert jnp.allclose(out, ref, rtol=1e-4, atol=1e-5), max_err

    print("KERNEL_OK")
</pallas_src>

<mosaic_0001>
module attributes {stable_mosaic.version = 11 : i64} {
  func.func @_pool_excite_kernel(%arg0: i32, %arg1: i32, %arg2: memref<1x4x4096xf32, #tpu.memory_space<vmem>>, %arg3: memref<2x4xf32, #tpu.memory_space<vmem>>, %arg4: memref<2x1xf32, #tpu.memory_space<vmem>>, %arg5: memref<2x1xf32, #tpu.memory_space<vmem>>, %arg6: memref<1x1xf32, #tpu.memory_space<vmem>>, %arg7: memref<4x1xf32, #tpu.memory_space<vmem>>, %arg8: memref<4x1xf32, #tpu.memory_space<vmem>>, %arg9: memref<1x4x1xf32, #tpu.memory_space<vmem>>, %arg10: memref<1x4xf32, #tpu.memory_space<vmem>>) attributes {dimension_semantics = [#tpu.dimension_semantics<parallel>, #tpu.dimension_semantics<arbitrary>], iteration_bounds = array<i64: 2, 1>, scalar_prefetch = 0 : i64, scratch_operands = 1 : i64, tpu.core_type = #tpu.core_type<tc>, window_params = [{transform_indices = @transform_0, window_bounds = array<i64: 1, 4, 4096>}, {pipeline_mode = #tpu.pipeline_mode<synchronous>, transform_indices = @transform_1, window_bounds = array<i64: 2, 4>}, {pipeline_mode = #tpu.pipeline_mode<synchronous>, transform_indices = @transform_2, window_bounds = array<i64: 2, 1>}, {pipeline_mode = #tpu.pipeline_mode<synchronous>, transform_indices = @transform_3, window_bounds = array<i64: 2, 1>}, {pipeline_mode = #tpu.pipeline_mode<synchronous>, transform_indices = @transform_4, window_bounds = array<i64: 1, 1>}, {pipeline_mode = #tpu.pipeline_mode<synchronous>, transform_indices = @transform_5, window_bounds = array<i64: 4, 1>}, {pipeline_mode = #tpu.pipeline_mode<synchronous>, transform_indices = @transform_6, window_bounds = array<i64: 4, 1>}, {transform_indices = @transform_7, window_bounds = array<i64: 1, 4, 1>}]} {
    %c0_i32 = arith.constant 0 : i32
    %0 = arith.cmpi eq, %arg1, %c0_i32 : i32
    %1 = arith.extui %0 : i1 to i32
    %c0_i32_0 = arith.constant 0 : i32
    %2 = arith.cmpi ne, %1, %c0_i32_0 : i32
    scf.if %2 {
      %cst_9 = arith.constant 0.000000e+00 : f32
      %11 = vector.broadcast %cst_9 : f32 to vector<1x4xf32>
      %c0_10 = arith.constant 0 : index
      %c0_11 = arith.constant 0 : index
      %12 = vector.load %arg10[%c0_10, %c0_11] : memref<1x4xf32, #tpu.memory_space<vmem>>, vector<1x4xf32>
      tpu.vector_store %arg10[%c0_10, %c0_11], %11 {strides = array<i32>} : memref<1x4xf32, #tpu.memory_space<vmem>>, vector<1x4xf32>,
    } else {
    }
    %c0 = arith.constant 0 : index
    %c0_1 = arith.constant 0 : index
    %c0_2 = arith.constant 0 : index
    %3 = vector.load %arg2[%c0, %c0_1, %c0_2] : memref<1x4x4096xf32, #tpu.memory_space<vmem>>, vector<1x4x4096xf32>
    %c0_3 = arith.constant 0 : index
    %c0_4 = arith.constant 0 : index
    %4 = vector.load %arg10[%c0_3, %c0_4] : memref<1x4xf32, #tpu.memory_space<vmem>>, vector<1x4xf32>
    %cst = arith.constant dense<0.000000e+00> : vector<1x4xf32>
    %5 = vector.multi_reduction <add>, %3, %cst [2] : vector<1x4x4096xf32> to vector<1x4xf32>
    %6 = arith.addf %4, %5 : vector<1x4xf32>
    %c0_5 = arith.constant 0 : index
    %c0_6 = arith.constant 0 : index
    %7 = vector.load %arg10[%c0_5, %c0_6] : memref<1x4xf32, #tpu.memory_space<vmem>>, vector<1x4xf32>
    tpu.vector_store %arg10[%c0_5, %c0_6], %6 {strides = array<i32>} : memref<1x4xf32, #tpu.memory_space<vmem>>, vector<1x4xf32>,
    %c0_i32_7 = arith.constant 0 : i32
    %8 = arith.cmpi eq, %arg1, %c0_i32_7 : i32
    %9 = arith.extui %8 : i1 to i32
    %c0_i32_8 = arith.constant 0 : i32
    %10 = arith.cmpi ne, %9, %c0_i32_8 : i32
    scf.if %10 {
      %c0_9 = arith.constant 0 : index
      %c0_10 = arith.constant 0 : index
      %11 = vector.load %arg10[%c0_9, %c0_10] : memref<1x4xf32, #tpu.memory_space<vmem>>, vector<1x4xf32>
      %cst_11 = arith.constant 2.44140625E-4 : f32
      %12 = vector.broadcast %cst_11 : f32 to vector<1x4xf32>
      %13 = arith.mulf %11, %12 : vector<1x4xf32>
      %c0_12 = arith.constant 0 : index
      %c0_13 = arith.constant 0 : index
      %14 = vector.load %arg3[%c0_12, %c0_13] : memref<2x4xf32, #tpu.memory_space<vmem>>, vector<2x4xf32>
      %15 = vector.broadcast %13 : vector<1x4xf32> to vector<2x4xf32>
      %16 = arith.mulf %15, %14 : vector<2x4xf32>
      %cst_14 = arith.constant dense<0.000000e+00> : vector<2xf32>
      %17 = vector.multi_reduction <add>, %16, %cst_14 [1] : vector<2x4xf32> to vector<2xf32>
      %18 = vector.shape_cast %17 : vector<2xf32> to vector<2x1xf32>
      %c0_15 = arith.constant 0 : index
      %c0_16 = arith.constant 0 : index
      %19 = vector.load %arg4[%c0_15, %c0_16] : memref<2x1xf32, #tpu.memory_space<vmem>>, vector<2x1xf32>
      %20 = arith.addf %18, %19 : vector<2x1xf32>
      %cst_17 = arith.constant 0.000000e+00 : f32
      %21 = vector.broadcast %cst_17 : f32 to vector<2x1xf32>
      %22 = arith.maximumf %20, %21 : vector<2x1xf32>
      %c0_18 = arith.constant 0 : index
      %c0_19 = arith.constant 0 : index
      %23 = vector.load %arg5[%c0_18, %c0_19] : memref<2x1xf32, #tpu.memory_space<vmem>>, vector<2x1xf32>
      %24 = arith.mulf %22, %23 : vector<2x1xf32>
      %cst_20 = arith.constant dense<0.000000e+00> : vector<1xf32>
      %25 = vector.multi_reduction <add>, %24, %cst_20 [0] : vector<2x1xf32> to vector<1xf32>
      %26 = vector.shape_cast %25 : vector<1xf32> to vector<1x1xf32>
      %c0_21 = arith.constant 0 : index
      %c0_22 = arith.constant 0 : index
      %27 = vector.load %arg6[%c0_21, %c0_22] : memref<1x1xf32, #tpu.memory_space<vmem>>, vector<1x1xf32>
      %28 = arith.addf %26, %27 : vector<1x1xf32>
      %cst_23 = arith.constant 0.000000e+00 : f32
      %29 = vector.broadcast %cst_23 : f32 to vector<1x1xf32>
      %30 = arith.subf %29, %28 : vector<1x1xf32>
      %31 = math.exp %30 : vector<1x1xf32>
      %cst_24 = arith.constant 1.000000e+00 : f32
      %32 = vector.broadcast %cst_24 : f32 to vector<1x1xf32>
      %33 = arith.addf %32, %31 : vector<1x1xf32>
      %cst_25 = arith.constant 1.000000e+00 : f32
      %34 = vector.broadcast %cst_25 : f32 to vector<1x1xf32>
      %35 = arith.divf %34, %33 : vector<1x1xf32>
      %c0_26 = arith.constant 0 : index
      %c0_27 = arith.constant 0 : index
      %36 = vector.load %arg7[%c0_26, %c0_27] : memref<4x1xf32, #tpu.memory_space<vmem>>, vector<4x1xf32>
      %37 = vector.broadcast %35 : vector<1x1xf32> to vector<4x1xf32>
      %38 = arith.mulf %37, %36 : vector<4x1xf32>
      %c0_28 = arith.constant 0 : index
      %c0_29 = arith.constant 0 : index
      %39 = vector.load %arg8[%c0_28, %c0_29] : memref<4x1xf32, #tpu.memory_space<vmem>>, vector<4x1xf32>
      %40 = arith.addf %38, %39 : vector<4x1xf32>
      %c0_30 = arith.constant 0 : index
      %c0_31 = arith.constant 0 : index
      %c0_32 = arith.constant 0 : index
      %41 = vector.load %arg9[%c0_30, %c0_31, %c0_32] : memref<1x4x1xf32, #tpu.memory_space<vmem>>, vector<1x4x1xf32>
      %42 = vector.shape_cast %41 : vector<1x4x1xf32> to vector<4x1xf32>
      %43 = vector.shape_cast %40 : vector<4x1xf32> to vector<1x4x1xf32>
      tpu.vector_store %arg9[%c0_30, %c0_31, %c0_32], %43 {strides = array<i32>} : memref<1x4x1xf32, #tpu.memory_space<vmem>>, vector<1x4x1xf32>,
    } else {
    }
    return
  }
  func.func @transform_0(%arg0: i32, %arg1: i32) -> (i32, i32, i32) {
    %c0_i32 = arith.constant 0 : i32
    %c0_i32_0 = arith.constant 0 : i32
    return %arg0, %c0_i32, %arg1 : i32, i32, i32
  }
  func.func @transform_1(%arg0: i32, %arg1: i32) -> (i32, i32) {
    %c0_i32 = arith.constant 0 : i32
    %c0_i32_0 = arith.constant 0 : i32
    %c0_i32_1 = arith.constant 0 : i32
    return %c0_i32, %c0_i32_0 : i32, i32
  }
  func.func @transform_2(%arg0: i32, %arg1: i32) -> (i32, i32) {
    %c0_i32 = arith.constant 0 : i32
    %c0_i32_0 = arith.constant 0 : i32
    %c0_i32_1 = arith.constant 0 : i32
    return %c0_i32, %c0_i32_0 : i32, i32
  }
  func.func @transform_3(%arg0: i32, %arg1: i32) -> (i32, i32) {
    %c0_i32 = arith.constant 0 : i32
    %c0_i32_0 = arith.constant 0 : i32
    %c0_i32_1 = arith.constant 0 : i32
    return %c0_i32, %c0_i32_0 : i32, i32
  }
  func.func @transform_4(%arg0: i32, %arg1: i32) -> (i32, i32) {
    %c0_i32 = arith.constant 0 : i32
    %c0_i32_0 = arith.constant 0 : i32
    %c0_i32_1 = arith.constant 0 : i32
    return %c0_i32, %c0_i32_0 : i32, i32
  }
  func.func @transform_5(%arg0: i32, %arg1: i32) -> (i32, i32) {
    %c0_i32 = arith.constant 0 : i32
    %c0_i32_0 = arith.constant 0 : i32
    %c0_i32_1 = arith.constant 0 : i32
    return %c0_i32, %c0_i32_0 : i32, i32
  }
  func.func @transform_6(%arg0: i32, %arg1: i32) -> (i32, i32) {
    %c0_i32 = arith.constant 0 : i32
    %c0_i32_0 = arith.constant 0 : i32
    %c0_i32_1 = arith.constant 0 : i32
    return %c0_i32, %c0_i32_0 : i32, i32
  }
  func.func @transform_7(%arg0: i32, %arg1: i32) -> (i32, i32, i32) {
    %c0_i32 = arith.constant 0 : i32
    %c0_i32_0 = arith.constant 0 : i32
    %c0_i32_1 = arith.constant 0 : i32
    return %arg0, %c0_i32, %c0_i32_0 : i32, i32, i32
  }
}

</mosaic_0001>

<bundles_post_ra>
// kernel: tpu_custom_call.1
= control target key start
LH: loop header
LB: loop body
LE: loop exit
PB: predicated region body
PF: predicated region fallthrough
CT: control target
= control target key end

     0   :  { %s1061_s0 = inlined_call_operand.hbm [shape: f32[2,4,4096], index: 0, kind: input, shape index: {}]   ;;  %s1062_s1 = inlined_call_operand.vmem [shape: f32[2,4], index: 1, kind: input, shape index: {}]   ;;  %s1063_s2 = inlined_call_operand.vmem [shape: f32[2,1], index: 2, kind: input, shape index: {}]   ;;  %s1064_s3 = inlined_call_operand.vmem [shape: f32[2,1], index: 3, kind: input, shape index: {}]   ;;  %s1065_s4 = inlined_call_operand.<no memory space> [shape: f32[1,1], index: 4, kind: input, shape index: {}]   ;;  %s1066_s5 = inlined_call_operand.vmem [shape: f32[4,1], index: 5, kind: input, shape index: {}]   ;;  %s1067_s6 = inlined_call_operand.vmem [shape: f32[4,1], index: 6, kind: input, shape index: {}]   ;;  %s1068_s7 = inlined_call_operand.vmem [shape: f32[2,4,1], index: 7, kind: output, shape index: {}]  }
   0x1   :  { %v12_v0 = vstv %s1065_s4 }
   0x2   :  { %13 = vst [vmem:[#allocation3] sm:$0x1] %v12_v0 }
   0x3   :  { %14 = vsyncpa [#allocation5], 0 }
   0x4   :  { %16 = vsyncpa [#allocation5 + $0x1], 0  ;;  %s864_s26 = smov 0   ;;  %s866_s27 = smov 0  }
   0x5   :  { %s868_s28 = smov 0   ;;  %s870_s29 = smov 0  }
   0x6   :  { %s872_s30 = smov 0   ;;  %s874_s8 = smov 0  }
   0x7 LB: > { %s643_s4 = sadd.s32 4294967295, %s815_s8   ;;  %s34_s9 = sadd.s32 1, %s811_s30  ;;  %s815_s8 = sphi %s874_s8, %s22_s8   ;;  %s811_s30 = sphi %s872_s30, %s1078_s30   ;;  %s807_s29 = sphi %s870_s29, %s1077_s29   ;;  %s803_s28 = sphi %s868_s28, %s1076_s28   ;;  %s799_s27 = sphi %s866_s27, %s1075_s27   ;;  %s795_s26 = sphi %s864_s26, %s1074_s26  }
   0x8   : > { %p36_p0 = scmp.ge.s32.totalorder %s34_s9, 2  ;;  %s43_s10 = sadd.s32 1, %s803_s28 }
   0x9   : > { %p50_p1 = scmp.ne.s32.totalorder %s803_s28, %s799_s27  ;;  %p51_p2 = scmp.eq.s32.totalorder %s815_s8, 0 }
   0xa   : > { %s1080_s9 = smov (%p36_p0, %s34_s9), 0  ;;  %p56_p4 = scmp.ne.s32.totalorder %s799_s27, %s795_s26 }
   0xb   : > { %p900_p3 = por %p51_p2, %p50_p1  ;;  %s38_s12 = ssub.s32 %s811_s30, %s1080_s9 }
   0xc   : > { %p57_p5 = scmp.eq.s32.totalorder %s643_s4, 0  ;;  %p41_p6 = scmp.eq.s32.totalorder %s38_s12, 0 }
   0xd   : > { %p662_p8 = scmp.lt.s32.totalorder %s815_s8, 2  ;;  %s250_s15 = sand.u32 1, %s803_s28  }
   0xe   : > { %p907_p7 = por %p57_p5, %p56_p4  ;;  %s655_s16 = sshll.u32 %s811_s30, 11 }
   0xf   : > { %s913_s14 = scalar_select %p41_p6, %s803_s28, %s43_s10  }
  0x10   : > { %s647_s17 = sshll.u32 %s250_s15, 7  ;;  %s920_s20 = scalar_lea.hbm %s1061_s0, %s655_s16 }
  0x11   : > { %s254_s21 = scalar_lea.vmem [#allocation4], %s647_s17  ;;  %p924_p9 = pnand %p662_p8, %p900_p3 }
  0x12   : > { %s264_s22 = sshll.u32 %s254_s21, 4  ;;  %s251_s24 = scalar_lea.sflag [#allocation5], %s250_s15  ;;  %s928_s22 = int_to_ptr.vmem [resolvable:$true] %s264_s22 }
  0x13   : > { %s735_s25 = scalar_lea.hbm %s920_s20, 2048  ;;  %p737_p13 = pneg %p924_p9 }
  0x14   : > { %p736_p12 = scmp.ne.s32.totalorder %s920_s20, %s735_s25  ;;  %s740_s10 = scalar_lea.hbm %s1061_s0, 4096 }
  0x15   : > { %p741_p2 = scmp.lt.u32.totalorder %s920_s20, %s1061_s0  ;;  %p742_p3 = scmp.lt.u32.totalorder %s740_s10, %s735_s25 }
  0x16   : > { %p738_p0 = pnand %p737_p13, %p736_p12  ;;  %p744_p5 = scmp.lt.u32.totalorder %s735_s25, %s920_s20 }
  0x17   : > { %p743_p4 = por %p742_p3, %p741_p2 }
  0x18   : > { %p739_p1 = pneg %p738_p0 }
  0x19   : > { %p745_p6 = por %p744_p5, %p743_p4 }
  0x1b   : > { %p746_p8 = pnand %p745_p6, %p739_p1 }
  0x1d   : > { %749 = shalt.err (!%p746_p8)
}
  0x1e   : > { %s750_s15 = scalar_lea.vmem %s928_s22, 2048  ;;  %s817_s16 = smov [#allocation4]  }
  0x1f   : > { %p751_p12 = scmp.ne.s32.totalorder %s928_s22, %s750_s15  ;;  %s755_s17 = sshll.u32 %s817_s16, 4  ;;  %s756_s17 = int_to_ptr.vmem [resolvable:$false] %s755_s17 }
  0x20   : > { %s757_s18 = scalar_lea.vmem %s756_s17, 4096  ;;  %p758_p11 = scmp.lt.s32.totalorder %s928_s22, %s756_s17 }
  0x21   : > { %p753_p0 = pnand %p751_p12, %p737_p13  ;;  %p759_p2 = scmp.lt.s32.totalorder %s757_s18, %s750_s15 }
  0x23   : > { %p754_p10 = pneg %p753_p0  ;;  %p760_p3 = por %p759_p2, %p758_p11 }
  0x25   : > { %p761_p4 = pnand %p760_p3, %p754_p10 }
  0x27   : > { %764 = shalt.err (!%p761_p4)
}
  0x28   : > { %661 = dma.hbm_to_vmem [thread:$0]  (!%p924_p9), %s920_s20, 2048, %s928_s22, %s251_s24  }
  0x29   : > { %p1072_p1 = scmp.lt.s32.totalorder %s815_s8, 3  ;;  %p1073_p5 = scmp.ge.s32.totalorder %s815_s8, 1 }
  0x2b   : > { %p270_p13 = pnand %p1073_p5, %p1072_p1 }
  0x2c   : > { %s275_s19 = sand.u32 (!%p270_p13), 1, %s799_s27  }
  0x2d   : > { %273 = sbr.rel (%p270_p13) target bundleno = 620 (0x26c), region = 48  ;;  %s651_s21 = sshll.u32 (!%p270_p13), %s275_s19, 7 }
  0x2e   : > { %s276_s25 = scalar_lea.sflag (!%p270_p13), [#allocation5], %s275_s19  ;;  %s962_s26 = scalar_lea.vmem (!%p270_p13), [#allocation4], %s651_s21 }
  0x34   : > { %790 = dma.done.wait (%p907_p7), %s276_s25, 2048  }
  0x35   : > { %792 = vsyncadd (%p907_p7), %s276_s25, 4294965248  ;;  %vm385_vm0 = vcmask 1043456   ;;  %v320_v1 = vld [vmem:[%s962_s26] sm:$0xff]  ;;  %v321_v2 = vld [vmem:[%s962_s26 + $0x8] sm:$0xff]  ;;  %vm318_vm1 = vcmask 24576   ;;  %vm532_vm2 = vcmask 25600  }
  0x36   : > { %v353_v3 = vcombine.high %v320_v1, %v320_v1  ;;  %v354_v4 = vcombine.high %v321_v2, %v321_v2  ;;  %v386_v5 = vsel %vm385_vm0, %v320_v1, 0.0  ;;  %v322_v6 = vld [vmem:[%s962_s26 + $0x10] sm:$0xff]  ;;  %v389_v8 = vsel %vm385_vm0, %v321_v2, 0.0  ;;  %v323_v12 = vld [vmem:[%s962_s26 + $0x18] sm:$0xff]  ;;  %v324_v18 = vld [vmem:[%s962_s26 + $0x20] sm:$0xff]  ;;  %p310_p7 = scmp.lt.s32.totalorder %s807_s29, 1 }
  0x37   : > { %v355_v10 = vcombine.high %v322_v6, %v322_v6  ;;  %v393_v14 = vsel %vm385_vm0, %v322_v6, 0.0  ;;  %v356_v16 = vcombine.high %v323_v12, %v323_v12  ;;  %v397_v20 = vsel %vm385_vm0, %v323_v12, 0.0  ;;  %v325_v24 = vld [vmem:[%s962_s26 + $0x28] sm:$0xff]  ;;  %v326_v30 = vld [vmem:[%s962_s26 + $0x30] sm:$0xff]  ;;  %v327_v36 = vld [vmem:[%s962_s26 + $0x38] sm:$0xff] }
  0x38   : > { %v387_v7 = vsel %vm385_vm0, %v353_v3, 0.0  ;;  %v391_v11 = vsel %vm385_vm0, %v354_v4, 0.0  ;;  %v357_v22 = vcombine.high %v324_v18, %v324_v18  ;;  %v401_v26 = vsel %vm385_vm0, %v324_v18, 0.0  ;;  %v328_v42 = vld [vmem:[%s962_s26 + $0x40] sm:$0xff]  ;;  %v329_v48 = vld [vmem:[%s962_s26 + $0x48] sm:$0xff]  ;;  %v330_v54 = vld [vmem:[%s962_s26 + $0x50] sm:$0xff] }
  0x39   : > { %v388_v9 = vadd.f32 %v387_v7, %v386_v5  ;;  %v395_v17 = vsel %vm385_vm0, %v355_v10, 0.0  ;;  %v399_v23 = vsel %vm385_vm0, %v356_v16, 0.0  ;;  %v358_v28 = vcombine.high %v325_v24, %v325_v24  ;;  %v331_v60 = vld [vmem:[%s962_s26 + $0x58] sm:$0xff]  ;;  %v332_v2 = vld [vmem:[%s962_s26 + $0x60] sm:$0xff]  ;;  %s1082_s29 = smov (!%p310_p7, %s807_s29), 1 }
  0x3a   : > { %v403_v29 = vsel %vm385_vm0, %v357_v22, 0.0  ;;  %v405_v32 = vsel %vm385_vm0, %v325_v24, 0.0  ;;  %v359_v34 = vcombine.high %v326_v30, %v326_v30  ;;  %v409_v38 = vsel %vm385_vm0, %v326_v30, 0.0  ;;  %s652_s12 = sshll.u32 %s1082_s29, 2 }
  0x3b   : > { %v390_v13 = vadd.f32 %v389_v8, %v388_v9  ;;  %v407_v35 = vsel %vm385_vm0, %v358_v28, 0.0  ;;  %v360_v40 = vcombine.high %v327_v36, %v327_v36  ;;  %v413_v44 = vsel %vm385_vm0, %v327_v36, 0.0  ;;  %v333_v8 = vld [vmem:[%s962_s26 + $0x68] sm:$0xff]  ;;  %s313_s19 = scalar_lea.vmem %s1068_s7, %s652_s12 }
  0x3c   : > { %v411_v41 = vsel %vm385_vm0, %v359_v34, 0.0  ;;  %v361_v46 = vcombine.high %v328_v42, %v328_v42  ;;  %v417_v50 = vsel %vm385_vm0, %v328_v42, 0.0  ;;  %v362_v52 = vcombine.high %v329_v48, %v329_v48 }
  0x3d   : > { %v392_v15 = vadd.f32 %v391_v11, %v390_v13  ;;  %v415_v47 = vsel %vm385_vm0, %v360_v40, 0.0  ;;  %v421_v56 = vsel %vm385_vm0, %v329_v48, 0.0  ;;  %v363_v58 = vcombine.high %v330_v54, %v330_v54 }
  0x3e   : > { %v419_v53 = vsel %vm385_vm0, %v361_v46, 0.0  ;;  %v423_v59 = vsel %vm385_vm0, %v362_v52, 0.0  ;;  %v425_v62 = vsel %vm385_vm0, %v330_v54, 0.0  ;;  %v364_v0 = vcombine.high %v331_v60, %v331_v60 }
  0x3f   : > { %v394_v19 = vadd.f32 %v393_v14, %v392_v15  ;;  %v427_v1 = vsel %vm385_vm0, %v363_v58, 0.0  ;;  %v429_v4 = vsel %vm385_vm0, %v331_v60, 0.0  ;;  %v365_v6 = vcombine.high %v332_v2, %v332_v2  ;;  %v334_v14 = vld [vmem:[%s962_s26 + $0x70] sm:$0xff] }
  0x40   : > { %v431_v7 = vsel %vm385_vm0, %v364_v0, 0.0  ;;  %v433_v10 = vsel %vm385_vm0, %v332_v2, 0.0  ;;  %v366_v12 = vcombine.high %v333_v8, %v333_v8  ;;  %v437_v16 = vsel %vm385_vm0, %v333_v8, 0.0  ;;  %v539_v8 = vld [vmem:[%s1064_s3] sm:$0x3] }
  0x41   : > { %v396_v21 = vadd.f32 %v395_v17, %v394_v19  ;;  %v435_v13 = vsel %vm385_vm0, %v365_v6, 0.0  ;;  %v367_v18 = vcombine.high %v334_v14, %v334_v14  ;;  %v441_v22 = vsel %vm385_vm0, %v334_v14, 0.0 }
  0x42   : > { %v439_v19 = vsel %vm385_vm0, %v366_v12, 0.0  ;;  %v452_v34 = vlaneseq  ;;  %vm541_vm3 = vcmask 1024   ;;  %vm565_vm4 = vcmask 3072  }
  0x43   : > { %v398_v25 = vadd.f32 %v397_v20, %v396_v21  ;;  %v335_v20 = vld [vmem:[%s962_s26 + $0x78] sm:$0xff] }
  0x44   : > { %v368_v24 = vcombine.high %v335_v20, %v335_v20 }
  0x45   : > { %v400_v27 = vadd.f32 %v399_v23, %v398_v25  ;;  %v443_v25 = vsel %vm385_vm0, %v367_v18, 0.0 }
  0x47   : > { %v402_v31 = vadd.f32 %v401_v26, %v400_v27  ;;  %v445_v27 = vsel %vm385_vm0, %v335_v20, 0.0 }
  0x49   : > { %v404_v33 = vadd.f32 %v403_v29, %v402_v31  ;;  %v447_v29 = vsel %vm385_vm0, %v368_v24, 0.0 }
  0x4b   : > { %v406_v37 = vadd.f32 %v405_v32, %v404_v33  ;;  %v818_v32 = vmov 0   ;;  %v819_v33 = vmov 0.0  }
  0x4c   : > { %714 = vset.pattern.permute.xlu0 %v818_v32  ;;  %319 = vst.msk [vmem:[#allocation2] sm:$0x1] %vm318_vm1, %v819_v33 }
  0x4d   : > { %v408_v39 = vadd.f32 %v407_v35, %v406_v37  ;;  %v820_v35 = vmov 1966171168   ;;  %v453_v37 = vshrl.u32 %v452_v34, 7 }
  0x4e   : > { %v471_v36 = vunpack.c.l.s4 %v820_v35 }
  0x4f   : > { %v410_v43 = vadd.f32 %v409_v38, %v408_v39  ;;  %v1017_v39 = vsub.s32 0, %v453_v37  ;;  %v458_v40 = vsub.s32 1, %v453_v37  ;;  %v466_v42 = vsub.s32 3, %v453_v37 }
  0x50   : > { %v472_v38 = vunpack.c.0.s8 %v471_v36 }
  0x51   : > { %v412_v45 = vadd.f32 %v411_v41, %v410_v43  ;;  %v462_v41 = vsub.s32 2, %v453_v37 }
  0x53   : > { %v414_v49 = vadd.f32 %v413_v44, %v412_v45  ;;  %v475_v44 = vsub.s32 %v472_v38, %v453_v37  ;;  %v336_v60 = vld [vmem:[#allocation2] sm:$0x1] }
  0x55   : > { %v416_v51 = vadd.f32 %v415_v47, %v414_v49 }
  0x57   : > { %v418_v55 = vadd.f32 %v417_v50, %v416_v51 }
  0x59   : > { %v420_v57 = vadd.f32 %v419_v53, %v418_v55  ;;  %v496_v55 = vand.u32 127, %v452_v34 }
  0x5b   : > { %v422_v61 = vadd.f32 %v421_v56, %v420_v57  ;;  %v499_v56 = vsub.s32 %v496_v55, %v453_v37 }
  0x5d   : > { %v424_v63 = vadd.f32 %v423_v59, %v422_v61 }
  0x5f   : > { %v426_v3 = vadd.f32 %v425_v62, %v424_v63 }
  0x61   : > { %v428_v5 = vadd.f32 %v427_v1, %v426_v3  ;;  %v524_v1 = vld [vmem:[%s1062_s1] sm:$0x3] }
  0x63   : > { %v430_v9 = vadd.f32 %v429_v4, %v428_v5  ;;  %v536_v5 = vld [vmem:[%s1063_s2] sm:$0x3] }
  0x65   : > { %v432_v11 = vadd.f32 %v431_v7, %v430_v9 }
  0x67   : > { %v434_v15 = vadd.f32 %v433_v10, %v432_v11 }
  0x69   : > { %v436_v17 = vadd.f32 %v435_v13, %v434_v15 }
  0x6b   : > { %v438_v21 = vadd.f32 %v437_v16, %v436_v17  ;;  %v549_v17 = vld [vmem:[#allocation3] sm:$0x1] }
  0x6d   : > { %v440_v23 = vadd.f32 %v439_v19, %v438_v21 }
  0x6f   : > { %v442_v26 = vadd.f32 %v441_v22, %v440_v23 }
  0x71   : > { %v444_v28 = vadd.f32 %v443_v25, %v442_v26  ;;  %v557_v25 = vld [vmem:[%s1066_s5] sm:$0xf] }
  0x73   : > { %v446_v30 = vadd.f32 %v445_v27, %v444_v28  ;;  %v563_v27 = vld [vmem:[%s1067_s6] sm:$0xf] }
  0x75   : > { %v448_v31 = vadd.f32 %v447_v29, %v446_v30 }
  0x77   : > { %449 = vadd.xlane.f32.xlu0 %v448_v31 }
 0x104   : > { %v450_v43 = vpop.xlane.xlu0 %449 }
 0x105   : > { %v455_v45 = vrot.slane %v450_v43, %v1017_v39  ;;  %v459_v46 = vrot.slane %v450_v43, %v458_v40  ;;  %v463_v47 = vrot.slane %v450_v43, %v462_v41  ;;  %v467_v48 = vrot.slane %v450_v43, %v466_v42 }
 0x107   : > { %v468_v49 = vcombine.low %v455_v45, %v459_v46  ;;  %v469_v50 = vcombine.low %v463_v47, %v467_v48 }
 0x109   : > { %v476_v51 = vrot.slane %v468_v49, %v475_v44  ;;  %v483_v52 = vrot.slane %v469_v50, %v475_v44 }
 0x10b   : > { %v484_v53 = vcombine.low %v476_v51, %v483_v52 }
 0x10d   : > { %v491_v54 = vrot.slane %v484_v53, %v475_v44 }
 0x10f   : > { %493 = vperm.xlu0 %714, %v491_v54  }
 0x18e   : > { %v494_v57 = vpop.permute.xlu0 %493 }
 0x18f   : > { %v500_v58 = vrot.slane %v494_v57, %v499_v56 }
 0x191   : > { %v507_v59 = vrot.slane %v500_v58, %v475_v44 }
 0x193   : > { %v514_v61 = vrot.slane %v507_v59, %v475_v44 }
 0x195   : > { %v516_v62 = vadd.f32 %v514_v61, %v336_v60 }
 0x197   : > { %518 = vst.msk [vmem:[#allocation2] sm:$0x1] %vm318_vm1, %v516_v62 }
 0x19e   : > { %v522_v63 = vld [vmem:[#allocation2] sm:$0x1] }
 0x19f   : > { %v523_v0 = vmul.f32 0.00024414063, %v522_v63 }
 0x1a1   : > { %v529_v2 = vrot.slane %v523_v0, %v1017_v39 }
 0x1a3   : > { %v531_v3 = vmul.f32 %v529_v2, %v524_v1 }
 0x1a5   : > { %v533_v4 = vsel %vm532_vm2, %v531_v3, 0.0 }
 0x1a6   : > { %534 = vadd.xlane.f32.xlu1 %v533_v4 }
 0x233   : > { %v535_v6 = vpop.xlane.xlu1 %534 }
 0x234   : > { %v537_v7 = vadd.f32 %v536_v5, %v535_v6 }
 0x236   : > { %v538_v9 = vmax.f32 %v537_v7, 0.0 }
 0x238   : > { %v540_v10 = vmul.f32 %v539_v8, %v538_v9 }
 0x23a   : > { %v542_v11 = vsel %vm541_vm3, %v540_v10, 0.0 }
 0x23b   : > { %v543_v12 = vrot.slane %v542_v11, 4 }
 0x23d   : > { %v544_v13 = vadd.f32 %v543_v12, %v542_v11 }
 0x23f   : > { %v545_v14 = vrot.slane %v544_v13, 2 }
 0x241   : > { %v546_v15 = vadd.f32 %v545_v14, %v544_v13 }
 0x243   : > { %v547_v16 = vrot.slane %v546_v15, 1 }
 0x245   : > { %v548_v18 = vadd.f32 %v547_v16, %v546_v15 }
 0x247   : > { %v550_v19 = vadd.f32 %v549_v17, %v548_v18 }
 0x249   : > { %v551_v20 = vsub.f32 0.0, %v550_v19 }
 0x24b   : > { %v552_v21 = vmul.f32 1.442695, %v551_v20 }
 0x24d   : > { %731 = vpow2.f32 %v552_v21 }
 0x257   : > { %v732_v22 = vpop.eup %731 }
 0x258   : > { %v554_v23 = vadd.f32 1.0, %v732_v22 }
 0x25a   : > { %733 = vrcp.f32 %v554_v23 }
 0x264   : > { %v734_v24 = vpop.eup %733 }
 0x265   : > { %v561_v26 = vrot.slane %v734_v24, %v1017_v39 }
 0x267   : > { %v562_v28 = vmul.f32 %v561_v26, %v557_v25 }
 0x269   : > { %v564_v29 = vadd.f32 %v563_v27, %v562_v28 }
 0x26b   : > { %566 = vst.msk [vmem:[%s313_s19] sm:$0xf] %vm565_vm4, %v564_v29 }
 0x26c PF: > { %s22_s8 = sadd.s32 1, %s815_s8   ;;  %s1074_s26 = smov %s799_s27 }
 0x26d   : > { %p19_p9 = scmp.ge.s32.totalorder %s22_s8, 4   ;;  %s1075_s27 = smov %s803_s28 }
 0x26e   : > { %s1076_s28 = smov %s913_s14  ;;  %s1077_s29 = smov %s811_s30 }
 0x26f   : > { %s1078_s30 = smov %s1080_s9  ;;  %21 = sbr.rel (!%p19_p9) target bundleno = 7 (0x7), region = 96 }
 0x276   :  { %586 = vsyncpa [#allocation5], 1 }
 0x277   :  { %588 = vsyncpa [#allocation5 + $0x1], 1 }

</bundles_post_ra>
